<compile_context>
chip_gen: v5e
topology: v5e:2x2
jax: 0.10.0
libtpu: 0.0.40
codegen_flags: <defaults>
</compile_context>

<pallas_src>
import functools

import jax
import jax.numpy as jnp
from jax.experimental import pallas as pl
from jax.experimental.pallas import tpu as pltpu

LN_EPS = 1e-5  # torch.nn.LayerNorm default eps


def track_layer_kernel(T, P, x_ref, w_ref, b_ref, g_ref, beta_ref,
                       pts_ref, trk_ref):
    # x_ref: (T*P, d) all points grouped by track; w_ref: (d, d); b/g/beta: (1, d)
    x = x_ref[...]                                              # (N, d)
    N, d = x.shape

    # MLP = Linear -> LayerNorm (biased variance, eps=1e-5, affine) -> ReLU,
    # as one batched matmul over every point.
    h = jnp.dot(x, w_ref[...], preferred_element_type=jnp.float32) + b_ref[...]
    mean = jnp.mean(h, axis=-1, keepdims=True)
    var = jnp.mean((h - mean) ** 2, axis=-1, keepdims=True)
    h = (h - mean) * jax.lax.rsqrt(var + LN_EPS)
    h = h * g_ref[...] + beta_ref[...]
    h = jnp.maximum(h, 0.0)

    # point_to_track + fn.max: per-track max over that track's P points.
    trk = jnp.max(h.reshape(T, P, d), axis=1)                   # (T, d)
    trk_ref[...] = trk

    # track_to_point (copy_src + sum of the single incoming message) is a
    # broadcast back to the points; concat with the original point state and
    # write once as a full block.
    pooled = jnp.broadcast_to(trk[:, None, :], (T, P, d)).reshape(N, d)
    pts_ref[...] = jnp.concatenate([x, pooled], axis=-1)        # (N, 2d)


def track_layer(x, w, b, gamma, beta):
    """TrackLayer forward.

    x:            [T, P, d]  'track_point' states, points grouped by track
    w:            [d, d]     Linear weight, already laid out so y = x @ w + b
                             (i.e. the transpose of torch's nn.Linear.weight)
    b,gamma,beta: [1, d]
    returns (track_point_feats [T, P, 2d], track_feats [T, d])
    """
    T, P, d = x.shape
    N = T * P
    xf = x.reshape(N, d)

    pts, trk = pl.pallas_call(
        functools.partial(track_layer_kernel, T, P),
        out_shape=(jax.ShapeDtypeStruct((N, 2 * d), jnp.float32),
                   jax.ShapeDtypeStruct((T, d), jnp.float32)),
        grid=(1,),
        in_specs=[
            pl.BlockSpec((N, d), lambda i: (0, 0)),
            pl.BlockSpec((d, d), lambda i: (0, 0)),
            pl.BlockSpec((1, d), lambda i: (0, 0)),
            pl.BlockSpec((1, d), lambda i: (0, 0)),
            pl.BlockSpec((1, d), lambda i: (0, 0)),
        ],
        out_specs=(
            pl.BlockSpec((N, 2 * d), lambda i: (0, 0)),
            pl.BlockSpec((T, d), lambda i: (0, 0)),
        ),
        compiler_params=pltpu.CompilerParams(
            dimension_semantics=("arbitrary",)),
    )(xf, w, b, gamma, beta)
    return pts.reshape(T, P, 2 * d), trk


# ---------------- pure-JAX reference for verification ----------------
def ref_forward(x, w, b, gamma, beta):
    h = x @ w + b
    mean = h.mean(-1, keepdims=True)
    var = ((h - mean) ** 2).mean(-1, keepdims=True)
    h = (h - mean) / jnp.sqrt(var + LN_EPS) * gamma + beta
    h = jnp.maximum(h, 0.0)
    trk = h.max(axis=1)                                         # [T, d]
    pts = jnp.concatenate(
        [x, jnp.broadcast_to(trk[:, None, :], x.shape)], axis=-1)
    return pts, trk


if __name__ == "__main__":
    input_size = 32
    T, P = 4, 8                          # 4 tracks, 8 points per track

    key = jax.random.PRNGKey(0)
    kx, kw, kb, kg, kbe = jax.random.split(key, 5)
    x = jax.random.normal(kx, (T, P, input_size), jnp.float32)
    w = jax.random.normal(kw, (input_size, input_size), jnp.float32) / jnp.sqrt(input_size)
    b = 0.1 * jax.random.normal(kb, (1, input_size), jnp.float32)
    gamma = 1.0 + 0.1 * jax.random.normal(kg, (1, input_size), jnp.float32)
    beta = 0.1 * jax.random.normal(kbe, (1, input_size), jnp.float32)

    pts, trk = track_layer(x, w, b, gamma, beta)
    pts, trk = jax.block_until_ready((pts, trk))

    ref_pts, ref_trk = ref_forward(x, w, b, gamma, beta)
    assert pts.shape == (T, P, 2 * input_size)
    assert trk.shape == (T, input_size)
    assert jnp.allclose(pts, ref_pts, atol=1e-4, rtol=1e-4), "point feats mismatch"
    assert jnp.allclose(trk, ref_trk, atol=1e-4, rtol=1e-4), "track feats mismatch"

    print("KERNEL_OK")
</pallas_src>

<mosaic_0001>
module attributes {stable_mosaic.version = 11 : i64} {
  func.func @track_layer_kernel(%arg0: i32, %arg1: memref<32x32xf32, #tpu.memory_space<vmem>>, %arg2: memref<32x32xf32, #tpu.memory_space<vmem>>, %arg3: memref<1x32xf32, #tpu.memory_space<vmem>>, %arg4: memref<1x32xf32, #tpu.memory_space<vmem>>, %arg5: memref<1x32xf32, #tpu.memory_space<vmem>>, %arg6: memref<32x64xf32, #tpu.memory_space<vmem>>, %arg7: memref<4x32xf32, #tpu.memory_space<vmem>>) attributes {dimension_semantics = [#tpu.dimension_semantics<arbitrary>], iteration_bounds = array<i64: 1>, scalar_prefetch = 0 : i64, scratch_operands = 0 : i64, tpu.core_type = #tpu.core_type<tc>, window_params = [{pipeline_mode = #tpu.pipeline_mode<synchronous>, transform_indices = @transform_0, window_bounds = array<i64: 32, 32>}, {pipeline_mode = #tpu.pipeline_mode<synchronous>, transform_indices = @transform_1, window_bounds = array<i64: 32, 32>}, {pipeline_mode = #tpu.pipeline_mode<synchronous>, transform_indices = @transform_2, window_bounds = array<i64: 1, 32>}, {pipeline_mode = #tpu.pipeline_mode<synchronous>, transform_indices = @transform_3, window_bounds = array<i64: 1, 32>}, {pipeline_mode = #tpu.pipeline_mode<synchronous>, transform_indices = @transform_4, window_bounds = array<i64: 1, 32>}, {pipeline_mode = #tpu.pipeline_mode<synchronous>, transform_indices = @transform_5, window_bounds = array<i64: 32, 64>}, {pipeline_mode = #tpu.pipeline_mode<synchronous>, transform_indices = @transform_6, window_bounds = array<i64: 4, 32>}]} {
    %c0 = arith.constant 0 : index
    %c0_0 = arith.constant 0 : index
    %0 = vector.load %arg1[%c0, %c0_0] : memref<32x32xf32, #tpu.memory_space<vmem>>, vector<32x32xf32>
    %c0_1 = arith.constant 0 : index
    %c0_2 = arith.constant 0 : index
    %1 = vector.load %arg2[%c0_1, %c0_2] : memref<32x32xf32, #tpu.memory_space<vmem>>, vector<32x32xf32>
    %cst = arith.constant dense<0.000000e+00> : vector<32x32xf32>
    %2 = tpu.matmul %0, %1, %cst {dimension_numbers = #tpu.dot_dimension_numbers<[1], [0], [0], [1], [0, 0, 1, 1], [], []>} : vector<32x32xf32>, vector<32x32xf32>, vector<32x32xf32> -> vector<32x32xf32>
    %c0_3 = arith.constant 0 : index
    %c0_4 = arith.constant 0 : index
    %3 = vector.load %arg3[%c0_3, %c0_4] : memref<1x32xf32, #tpu.memory_space<vmem>>, vector<1x32xf32>
    %4 = vector.broadcast %3 : vector<1x32xf32> to vector<32x32xf32>
    %5 = arith.addf %2, %4 : vector<32x32xf32>
    %cst_5 = arith.constant dense<0.000000e+00> : vector<32xf32>
    %6 = vector.multi_reduction <add>, %5, %cst_5 [1] : vector<32x32xf32> to vector<32xf32>
    %7 = vector.shape_cast %6 : vector<32xf32> to vector<32x1xf32>
    %cst_6 = arith.constant 3.200000e+01 : f32
    %8 = vector.broadcast %cst_6 : f32 to vector<32x1xf32>
    %9 = arith.divf %7, %8 : vector<32x1xf32>
    %10 = vector.broadcast %9 : vector<32x1xf32> to vector<32x32xf32>
    %11 = arith.subf %5, %10 : vector<32x32xf32>
    %12 = arith.mulf %11, %11 : vector<32x32xf32>
    %cst_7 = arith.constant dense<0.000000e+00> : vector<32xf32>
    %13 = vector.multi_reduction <add>, %12, %cst_7 [1] : vector<32x32xf32> to vector<32xf32>
    %14 = vector.shape_cast %13 : vector<32xf32> to vector<32x1xf32>
    %cst_8 = arith.constant 3.200000e+01 : f32
    %15 = vector.broadcast %cst_8 : f32 to vector<32x1xf32>
    %16 = arith.divf %14, %15 : vector<32x1xf32>
    %17 = vector.broadcast %9 : vector<32x1xf32> to vector<32x32xf32>
    %18 = arith.subf %5, %17 : vector<32x32xf32>
    %cst_9 = arith.constant 9.99999974E-6 : f32
    %19 = vector.broadcast %cst_9 : f32 to vector<32x1xf32>
    %20 = arith.addf %16, %19 : vector<32x1xf32>
    %21 = math.rsqrt %20 : vector<32x1xf32>
    %22 = vector.broadcast %21 : vector<32x1xf32> to vector<32x32xf32>
    %23 = arith.mulf %18, %22 : vector<32x32xf32>
    %c0_10 = arith.constant 0 : index
    %c0_11 = arith.constant 0 : index
    %24 = vector.load %arg4[%c0_10, %c0_11] : memref<1x32xf32, #tpu.memory_space<vmem>>, vector<1x32xf32>
    %25 = vector.broadcast %24 : vector<1x32xf32> to vector<32x32xf32>
    %26 = arith.mulf %23, %25 : vector<32x32xf32>
    %c0_12 = arith.constant 0 : index
    %c0_13 = arith.constant 0 : index
    %27 = vector.load %arg5[%c0_12, %c0_13] : memref<1x32xf32, #tpu.memory_space<vmem>>, vector<1x32xf32>
    %28 = vector.broadcast %27 : vector<1x32xf32> to vector<32x32xf32>
    %29 = arith.addf %26, %28 : vector<32x32xf32>
    %cst_14 = arith.constant 0.000000e+00 : f32
    %30 = vector.broadcast %cst_14 : f32 to vector<32x32xf32>
    %31 = arith.maximumf %29, %30 : vector<32x32xf32>
    %32 = vector.shape_cast %31 : vector<32x32xf32> to vector<4x8x32xf32>
    %cst_15 = arith.constant dense<0xFF800000> : vector<4x32xf32>
    %33 = vector.multi_reduction <maximumf>, %32, %cst_15 [1] : vector<4x8x32xf32> to vector<4x32xf32>
    %c0_16 = arith.constant 0 : index
    %c0_17 = arith.constant 0 : index
    %34 = vector.load %arg7[%c0_16, %c0_17] : memref<4x32xf32, #tpu.memory_space<vmem>>, vector<4x32xf32>
    tpu.vector_store %arg7[%c0_16, %c0_17], %33 {strides = array<i32>} : memref<4x32xf32, #tpu.memory_space<vmem>>, vector<4x32xf32>,
    %35 = vector.shape_cast %33 : vector<4x32xf32> to vector<4x1x32xf32>
    %36 = vector.shape_cast %35 : vector<4x1x32xf32> to vector<4x1x32xf32>
    %37 = vector.broadcast %36 : vector<4x1x32xf32> to vector<4x8x32xf32>
    %38 = vector.shape_cast %37 : vector<4x8x32xf32> to vector<32x32xf32>
    %39 = tpu.concatenate %0, %38 in 1 : vector<32x32xf32>, vector<32x32xf32> -> vector<32x64xf32>
    %c0_18 = arith.constant 0 : index
    %c0_19 = arith.constant 0 : index
    %40 = vector.load %arg6[%c0_18, %c0_19] : memref<32x64xf32, #tpu.memory_space<vmem>>, vector<32x64xf32>
    tpu.vector_store %arg6[%c0_18, %c0_19], %39 {strides = array<i32>} : memref<32x64xf32, #tpu.memory_space<vmem>>, vector<32x64xf32>,
    return
  }
  func.func @transform_0(%arg0: i32) -> (i32, i32) {
    %c0_i32 = arith.constant 0 : i32
    %c0_i32_0 = arith.constant 0 : i32
    %c0_i32_1 = arith.constant 0 : i32
    return %c0_i32, %c0_i32_0 : i32, i32
  }
  func.func @transform_1(%arg0: i32) -> (i32, i32) {
    %c0_i32 = arith.constant 0 : i32
    %c0_i32_0 = arith.constant 0 : i32
    %c0_i32_1 = arith.constant 0 : i32
    return %c0_i32, %c0_i32_0 : i32, i32
  }
  func.func @transform_2(%arg0: i32) -> (i32, i32) {
    %c0_i32 = arith.constant 0 : i32
    %c0_i32_0 = arith.constant 0 : i32
    %c0_i32_1 = arith.constant 0 : i32
    return %c0_i32, %c0_i32_0 : i32, i32
  }
  func.func @transform_3(%arg0: i32) -> (i32, i32) {
    %c0_i32 = arith.constant 0 : i32
    %c0_i32_0 = arith.constant 0 : i32
    %c0_i32_1 = arith.constant 0 : i32
    return %c0_i32, %c0_i32_0 : i32, i32
  }
  func.func @transform_4(%arg0: i32) -> (i32, i32) {
    %c0_i32 = arith.constant 0 : i32
    %c0_i32_0 = arith.constant 0 : i32
    %c0_i32_1 = arith.constant 0 : i32
    return %c0_i32, %c0_i32_0 : i32, i32
  }
  func.func @transform_5(%arg0: i32) -> (i32, i32) {
    %c0_i32 = arith.constant 0 : i32
    %c0_i32_0 = arith.constant 0 : i32
    %c0_i32_1 = arith.constant 0 : i32
    return %c0_i32, %c0_i32_0 : i32, i32
  }
  func.func @transform_6(%arg0: i32) -> (i32, i32) {
    %c0_i32 = arith.constant 0 : i32
    %c0_i32_0 = arith.constant 0 : i32
    %c0_i32_1 = arith.constant 0 : i32
    return %c0_i32, %c0_i32_0 : i32, i32
  }
}

</mosaic_0001>

<bundles_post_ra>
// kernel: tpu_custom_call.1
= control target key start
LH: loop header
LB: loop body
LE: loop exit
PB: predicated region body
PF: predicated region fallthrough
CT: control target
= control target key end

     0   :  { %12 = vsyncpa [#allocation3], 0  ;;  %s592_s0 = inlined_call_operand.hbm [shape: f32[32,32], index: 0, kind: input, shape index: {}]   ;;  %s593_s1 = inlined_call_operand.hbm [shape: f32[32,32], index: 1, kind: input, shape index: {}]   ;;  %s594_s2 = inlined_call_operand.vmem [shape: f32[1,32], index: 2, kind: input, shape index: {}]   ;;  %s595_s3 = inlined_call_operand.vmem [shape: f32[1,32], index: 3, kind: input, shape index: {}]   ;;  %s596_s4 = inlined_call_operand.vmem [shape: f32[1,32], index: 4, kind: input, shape index: {}]   ;;  %s597_s5 = inlined_call_operand.hbm [shape: f32[32,64], index: 5, kind: output, shape index: {0}]   ;;  %s598_s6 = inlined_call_operand.hbm [shape: f32[4,32], index: 6, kind: output, shape index: {1}]  }
   0x1   :  { %13 = vsyncpa [#allocation6], 0 }
   0x2   :  { %14 = vsyncpa [#allocation4], 0 }
   0x3   :  { %15 = vsyncpa [#allocation9], 0  ;;  %s20_s23 = sshll.u32 %s592_s0, 4  ;;  %s464_s24 = smov [#allocation2]   ;;  %s21_s23 = int_to_ptr.hbm [resolvable:$true] %s20_s23 }
   0x4   :  { %s22_s25 = sshll.u32 %s464_s24, 4  ;;  %s33_s28 = sshll.u32 %s593_s1, 4  ;;  %s23_s25 = int_to_ptr.vmem [resolvable:$true] %s22_s25  ;;  %s34_s28 = int_to_ptr.hbm [resolvable:$true] %s33_s28 }
   0x5   :  { %s465_s29 = smov 128   ;;  %s466_s30 = smov 8  }
   0x6   :  { %28 = dma.hbm_to_vmem [thread:$0]  %s21_s23, 512, %s23_s25, [#allocation3], %s465_s29, %s465_s29, %s466_s30  }
   0x7   :  { %s467_s7 = smov [#allocation5]  }
   0x8   :  { %s35_s8 = sshll.u32 %s467_s7, 4  ;;  %s36_s8 = int_to_ptr.vmem [resolvable:$true] %s35_s8 }
   0x9   :  { %41 = dma.hbm_to_vmem [thread:$0]  %s34_s28, 512, %s36_s8, [#allocation6], %s465_s29, %s465_s29, %s466_s30  }
   0xa   :  { %456 = dma.done.wait [#allocation3], 512  }
   0xb   :  { %457 = vsyncadd [#allocation3], 4294966784 }
   0xc   :  { %458 = dma.done.wait [#allocation6], 512  }
   0xd   :  { %459 = vsyncadd [#allocation6], 4294966784  ;;  %v63_v0 = vld [vmem:[#allocation5 + $0x18] sm:$0xff]  ;;  %v62_v1 = vld [vmem:[#allocation5 + $0x10] sm:$0xff]  ;;  %vm68_vm0 = vcmask 261120   ;;  %v468_v21 = vmov 32.0  }
   0xe   :  { %93 = vmatpush.msra.mxu0 %v63_v0  ;;  %328 = vmatpush.msra.mxu2 %v63_v0  ;;  %v61_v2 = vld [vmem:[#allocation5 + $0x8] sm:$0xff]  ;;  %v60_v3 = vld [vmem:[#allocation5] sm:$0xff]  ;;  %v521_v5 = vld [vmem:[#allocation2 + $0x10] sm:$0xff]  ;;  %350 = vrcp.f32 %v468_v21  ;;  %vm257_vm14 = vcmask 1041409   ;;  %vm259_vm15 = vcmask 1042434   ;;  %s307_s15 = sshll.u32 %s598_s6, 4  ;;  %s308_s15 = int_to_ptr.hbm [resolvable:$true] %s307_s15 }
   0xf   :  { %327 = vmatpush.msra.mxu1 %v63_v0  ;;  %329 = vmatpush.msra.mxu3 %v63_v0  ;;  %v519_v4 = vld [vmem:[#allocation2] sm:$0xff]  ;;  %v523_v6 = vld [vmem:[#allocation2 + $0x8] sm:$0xff]  ;;  %v525_v7 = vld [vmem:[#allocation2 + $0x18] sm:$0xff]  ;;  %s471_s6 = smov [#allocation7]   ;;  %s293_s19 = sshll.u32 %s597_s5, 4  ;;  %s294_s19 = int_to_ptr.hbm [resolvable:$true] %s293_s19 }
  0x10   :  { %94 = vmatpush.msra.mxu0 %v62_v1  ;;  %331 = vmatpush.msra.mxu2 %v62_v1  ;;  %v347_v8 = vld [vmem:[%s594_s2] ss:$0 sm:$0xff]  ;;  %s291_s16 = sshll.u32 %s471_s6, 4  ;;  %s292_s16 = int_to_ptr.vmem [resolvable:$true] %s291_s16 }
  0x11   :  { %330 = vmatpush.msra.mxu1 %v62_v1  ;;  %332 = vmatpush.msra.mxu3 %v62_v1 }
  0x12   :  { %95 = vmatpush.msra.mxu0 %v61_v2  ;;  %334 = vmatpush.msra.mxu2 %v61_v2 }
  0x13   :  { %333 = vmatpush.msra.mxu1 %v61_v2  ;;  %335 = vmatpush.msra.mxu3 %v61_v2 }
  0x14   :  { %96 = vmatpush.msra.mxu0 %v60_v3  ;;  %337 = vmatpush.msra.mxu2 %v60_v3  ;;  %v351_v22 = vpop.eup %350 }
  0x15   :  { %323 = vmatmul.msk.f32.vlgmr.msra.gmra.mxu0 %vm68_vm0, %v519_v4  ;;  %325 = vmatmul.msk.f32.vlgmr.msra.gmra.mxu2 %vm68_vm0, %v521_v5  ;;  %v123_v23 = vmul.f32 32.0, %v351_v22  ;;  %vm127_vm1 = vweird.f32 %v351_v22 }
  0x16   :  { %336 = vmatpush.msra.mxu1 %v60_v3  ;;  %338 = vmatpush.msra.mxu3 %v60_v3 }
  0x17   :  { %324 = vmatmul.msk.f32.vlgmr.msra.gmra.mxu1 %vm68_vm0, %v523_v6  ;;  %326 = vmatmul.msk.f32.vlgmr.msra.gmra.mxu3 %vm68_vm0, %v525_v7  ;;  %v124_v24 = vsub.f32 1.0, %v123_v23 }
  0x19   :  { %v125_v25 = vmul.f32 %v351_v22, %v124_v24 }
  0x1b   :  { %v126_v26 = vadd.f32 %v351_v22, %v125_v25 }
  0x1d   :  { %v128_v27 = vsel %vm127_vm1, %v351_v22, %v126_v26  ;;  %vm261_vm1 = vcmask 1043459  }
  0x92   :  { %v98_v9 = vpop.f32.mrf.mxu0 }
  0x93   :  { %v99_v10 = vadd.f32 %v347_v8, %v98_v9 }
  0x94   :  { %v101_v11 = vpop.f32.mrf.mxu1 }
  0x95   :  { %v110_v12 = vsel %vm68_vm0, %v99_v10, 0.0  ;;  %v102_v13 = vadd.f32 %v347_v8, %v101_v11  ;;  %v348_v11 = vld [vmem:[%s595_s3] ss:$0 sm:$0xff]  ;;  %s469_s3 = smov 32  }
  0x96   :  { %111 = vadd.xlane.f32.xlu0 %v110_v12 }
  0x97   :  { %v113_v18 = vsel %vm68_vm0, %v102_v13, 0.0 }
  0x98   :  { %v104_v14 = vpop.f32.mrf.mxu2 }
  0x99   :  { %v105_v15 = vadd.f32 %v347_v8, %v104_v14 }
  0x9a   :  { %v107_v16 = vpop.f32.mrf.mxu3 }
  0x9b   :  { %v116_v17 = vsel %vm68_vm0, %v105_v15, 0.0  ;;  %v108_v19 = vadd.f32 %v347_v8, %v107_v16  ;;  %v349_v16 = vld [vmem:[%s596_s4] ss:$0 sm:$0xff]  ;;  %s470_s4 = smov [#allocation8]  }
  0x9c   :  { %117 = vadd.xlane.f32.xlu1 %v116_v17  ;;  %s305_s12 = sshll.u32 %s470_s4, 4  ;;  %s306_s12 = int_to_ptr.vmem [resolvable:$true] %s305_s12 }
  0x9d   :  { %v119_v20 = vsel %vm68_vm0, %v108_v19, 0.0 }
  0x9e   :  { %114 = vadd.xlane.f32.xlu0 %v113_v18 }
  0xa4   :  { %120 = vadd.xlane.f32.xlu1 %v119_v20 }
 0x109   :  { %v112_v28 = vpop.xlane.xlu0 %111 }
 0x10a   :  { %v129_v29 = vmul.f32 %v128_v27, %v112_v28 }
 0x10c   :  { %v133_v30 = vsub.f32 %v99_v10, %v129_v29 }
 0x10e   :  { %v137_v31 = vmul.f32 %v133_v30, %v133_v30 }
 0x10f   :  { %v118_v32 = vpop.xlane.xlu1 %117 }
 0x110   :  { %v131_v33 = vmul.f32 %v128_v27, %v118_v32  ;;  %v141_v34 = vsel %vm68_vm0, %v137_v31, 0.0 }
 0x111   :  { %142 = vadd.xlane.f32.xlu2 %v141_v34  ;;  %v115_v35 = vpop.xlane.xlu0 %114 }
 0x112   :  { %v543_v36 = vsub.f32 %v105_v15, %v131_v33  ;;  %v130_v37 = vmul.f32 %v128_v27, %v115_v35 }
 0x114   :  { %v545_v38 = vsub.f32 %v102_v13, %v130_v37  ;;  %v139_v39 = vmul.f32 %v543_v36, %v543_v36 }
 0x116   :  { %v147_v40 = vsel %vm68_vm0, %v139_v39, 0.0  ;;  %v138_v41 = vmul.f32 %v545_v38, %v545_v38 }
 0x117   :  { %v121_v42 = vpop.xlane.xlu1 %120  ;;  %148 = vadd.xlane.f32.xlu0 %v147_v40 }
 0x118   :  { %v132_v43 = vmul.f32 %v128_v27, %v121_v42  ;;  %v144_v44 = vsel %vm68_vm0, %v138_v41, 0.0 }
 0x119   :  { %145 = vadd.xlane.f32.xlu2 %v144_v44 }
 0x11a   :  { %v553_v45 = vsub.f32 %v108_v19, %v132_v43 }
 0x11c   :  { %v140_v46 = vmul.f32 %v553_v45, %v553_v45 }
 0x11e   :  { %v150_v47 = vsel %vm68_vm0, %v140_v46, 0.0 }
 0x11f   :  { %151 = vadd.xlane.f32.xlu1 %v150_v47 }
 0x184   :  { %v143_v48 = vpop.xlane.xlu2 %142 }
 0x185   :  { %v153_v49 = vmul.f32 %v143_v48, %v128_v27 }
 0x187   :  { %v157_v50 = vadd.f32 1e-05, %v153_v49 }
 0x189   :  { %352 = vrsqrt.f32 %v157_v50  ;;  %vm167_vm3 = vweird.f32 %v157_v50 }
 0x18a   :  { %v149_v51 = vpop.xlane.xlu0 %148 }
 0x18b   :  { %v155_v52 = vmul.f32 %v149_v51, %v128_v27 }
 0x18c   :  { %v146_v53 = vpop.xlane.xlu2 %145 }
 0x18d   :  { %v159_v54 = vadd.f32 1e-05, %v155_v52  ;;  %v154_v55 = vmul.f32 %v146_v53, %v128_v27 }
 0x18f   :  { %v353_v56 = vpop.eup %352  ;;  %354 = vrsqrt.f32 %v159_v54  ;;  %v158_v57 = vadd.f32 1e-05, %v154_v55  ;;  %vm187_vm6 = vweird.f32 %v159_v54 }
 0x190   :  { %v162_v58 = vmul.f32 %v353_v56, %v157_v50  ;;  %vm168_vm2 = vweird.f32 %v353_v56 }
 0x191   :  { %356 = vrsqrt.f32 %v158_v57  ;;  %vm169_vm4 = vmor %vm167_vm3, %vm168_vm2  ;;  %vm177_vm9 = vweird.f32 %v158_v57  ;;  %vm264_vm2 = vcmask 257024   ;;  %vm282_vm3 = vcmask 523264  }
 0x192   :  { %v163_v59 = vmul.f32 %v353_v56, %v162_v58  ;;  %v152_v60 = vpop.xlane.xlu1 %151 }
 0x193   :  { %v156_v61 = vmul.f32 %v152_v60, %v128_v27 }
 0x194   :  { %v164_v62 = vmul.f32 0.5, %v163_v59 }
 0x195   :  { %v355_v63 = vpop.eup %354  ;;  %v160_v0 = vadd.f32 1e-05, %v156_v61 }
 0x196   :  { %v165_v1 = vsub.f32 1.5, %v164_v62  ;;  %v182_v2 = vmul.f32 %v355_v63, %v159_v54  ;;  %vm188_vm5 = vweird.f32 %v355_v63 }
 0x197   :  { %v357_v3 = vpop.eup %356  ;;  %358 = vrsqrt.f32 %v160_v0  ;;  %vm189_vm8 = vmor %vm187_vm6, %vm188_vm5  ;;  %vm197_vm12 = vweird.f32 %v160_v0 }
 0x198   :  { %v166_v8 = vmul.f32 %v353_v56, %v165_v1  ;;  %v183_v9 = vmul.f32 %v355_v63, %v182_v2  ;;  %v172_v10 = vmul.f32 %v357_v3, %v158_v57  ;;  %vm178_vm7 = vweird.f32 %v357_v3 }
 0x199   :  { %vm179_vm10 = vmor %vm177_vm9, %vm178_vm7 }
 0x19a   :  { %v170_v12 = vsel %vm169_vm4, %v353_v56, %v166_v8  ;;  %v184_v13 = vmul.f32 0.5, %v183_v9  ;;  %v173_v14 = vmul.f32 %v357_v3, %v172_v10 }
 0x19b   :  { %v201_v15 = vmul.f32 %v170_v12, %v133_v30 }
 0x19c   :  { %v185_v17 = vsub.f32 1.5, %v184_v13  ;;  %v174_v18 = vmul.f32 0.5, %v173_v14 }
 0x19d   :  { %v359_v19 = vpop.eup %358  ;;  %v209_v20 = vmul.f32 %v348_v11, %v201_v15 }
 0x19e   :  { %v186_v21 = vmul.f32 %v355_v63, %v185_v17  ;;  %v175_v22 = vsub.f32 1.5, %v174_v18  ;;  %v192_v23 = vmul.f32 %v359_v19, %v160_v0  ;;  %vm198_vm11 = vweird.f32 %v359_v19 }
 0x19f   :  { %v217_v24 = vadd.f32 %v349_v16, %v209_v20  ;;  %vm199_vm13 = vmor %vm197_vm12, %vm198_vm11 }
 0x1a0   :  { %v190_v25 = vsel %vm189_vm8, %v355_v63, %v186_v21  ;;  %v176_v26 = vmul.f32 %v357_v3, %v175_v22  ;;  %v193_v27 = vmul.f32 %v359_v19, %v192_v23 }
 0x1a1   :  { %v203_v28 = vmul.f32 %v190_v25, %v543_v36  ;;  %v221_v29 = vmax.f32 %v217_v24, 0.0 }
 0x1a2   :  { %v180_v30 = vsel %vm179_vm10, %v357_v3, %v176_v26  ;;  %v194_v31 = vmul.f32 0.5, %v193_v27 }
 0x1a3   :  { %v211_v32 = vmul.f32 %v348_v11, %v203_v28  ;;  %v202_v33 = vmul.f32 %v180_v30, %v545_v38  ;;  %v225_v34 = vsel %vm68_vm0, %v221_v29, -inf }
 0x1a4   :  { %v195_v35 = vsub.f32 1.5, %v194_v31  ;;  %v226_v37 = vrot.slane %v225_v34, 4 }
 0x1a5   :  { %v210_v39 = vmul.f32 %v348_v11, %v202_v33  ;;  %v219_v40 = vadd.f32 %v349_v16, %v211_v32 }
 0x1a6   :  { %v196_v41 = vmul.f32 %v359_v19, %v195_v35  ;;  %v227_v42 = vmax.f32 %v225_v34, %v226_v37 }
 0x1a7   :  { %v223_v43 = vmax.f32 %v219_v40, 0.0  ;;  %v218_v36 = vadd.f32 %v349_v16, %v210_v39 }
 0x1a8   :  { %v200_v44 = vsel %vm199_vm13, %v359_v19, %v196_v41  ;;  %v228_v46 = vrot.slane %v227_v42, 2 }
 0x1a9   :  { %v204_v47 = vmul.f32 %v200_v44, %v553_v45  ;;  %v239_v48 = vsel %vm68_vm0, %v223_v43, -inf  ;;  %v222_v38 = vmax.f32 %v218_v36, 0.0 }
 0x1aa   :  { %v229_v49 = vmax.f32 %v227_v42, %v228_v46  ;;  %v240_v50 = vrot.slane %v239_v48, 4 }
 0x1ab   :  { %v212_v51 = vmul.f32 %v348_v11, %v204_v47  ;;  %v232_v52 = vsel %vm68_vm0, %v222_v38, -inf }
 0x1ac   :  { %v230_v53 = vrot.slane %v229_v49, 1  ;;  %v241_v54 = vmax.f32 %v239_v48, %v240_v50  ;;  %v233_v55 = vrot.slane %v232_v52, 4 }
 0x1ad   :  { %v220_v56 = vadd.f32 %v349_v16, %v212_v51 }
 0x1ae   :  { %v231_v57 = vmax.f32 %v229_v49, %v230_v53  ;;  %v242_v58 = vrot.slane %v241_v54, 2  ;;  %v234_v59 = vmax.f32 %v232_v52, %v233_v55 }
 0x1af   :  { %v224_v60 = vmax.f32 %v220_v56, 0.0 }
 0x1b0   :  { %266 = vrot.lane.b32.xlu2 %v231_v57, %s469_s3  ;;  %v243_v61 = vmax.f32 %v241_v54, %v242_v58  ;;  %v235_v45 = vrot.slane %v234_v59, 2 }
 0x1b1   :  { %v246_v62 = vsel %vm68_vm0, %v224_v60, -inf }
 0x1b2   :  { %v244_v63 = vrot.slane %v243_v61, 1  ;;  %v236_v0 = vmax.f32 %v234_v59, %v235_v45  ;;  %v247_v1 = vrot.slane %v246_v62, 4 }
 0x1b4   :  { %v245_v2 = vmax.f32 %v243_v61, %v244_v63  ;;  %v237_v3 = vrot.slane %v236_v0, 1  ;;  %v248_v8 = vmax.f32 %v246_v62, %v247_v1 }
 0x1b6   :  { %270 = vrot.lane.b32.xlu1 %v245_v2, %s469_s3  ;;  %v238_v9 = vmax.f32 %v236_v0, %v237_v3  ;;  %v249_v10 = vrot.slane %v248_v8, 2 }
 0x1b8   :  { %268 = vrot.lane.b32.xlu0 %v238_v9, %s469_s3  ;;  %v250_v11 = vmax.f32 %v248_v8, %v249_v10  ;;  %v258_v12 = vsel %vm257_vm14, %v238_v9, %v231_v57 }
 0x1b9   :  { %v260_v15 = vsel %vm259_vm15, %v245_v2, %v258_v12 }
 0x1ba   :  { %v251_v13 = vrot.slane %v250_v11, 1 }
 0x1bc   :  { %v252_v14 = vmax.f32 %v250_v11, %v251_v13 }
 0x1be   :  { %272 = vrot.lane.b32.xlu2 %v252_v14, %s469_s3  ;;  %v262_v16 = vsel %vm261_vm1, %v252_v14, %v260_v15 }
 0x1bf   :  { %265 = vst.msk [vmem:[#allocation8] sm:$0xf] %vm264_vm2, %v262_v16 }
 0x1c0   :  { %310 = dma.vmem_to_hbm [thread:$0]  %s306_s12, 64, %s308_s15, [#allocation9]  }
 0x20a   :  { %v267_v17 = vpop.permute.xlu2 %266 }
 0x20b   :  { %v278_v18 = vsel %vm68_vm0, %v519_v4, %v267_v17 }
 0x20c   :  { %283 = vst.msk [vmem:[#allocation7] sm:$0xff] %vm282_vm3, %v278_v18 }
 0x218   :  { %v273_v19 = vpop.permute.xlu2 %272 }
 0x219   :  { %v281_v20 = vsel %vm68_vm0, %v525_v7, %v273_v19 }
 0x21a   :  { %286 = vst.msk [vmem:[#allocation7 + $0x18] sm:$0xff] %vm282_vm3, %v281_v20 }
 0x228   :  { %v271_v21 = vpop.permute.xlu1 %270 }
 0x229   :  { %v280_v22 = vsel %vm68_vm0, %v521_v5, %v271_v21 }
 0x22a   :  { %285 = vst.msk [vmem:[#allocation7 + $0x10] sm:$0xff] %vm282_vm3, %v280_v22  ;;  %v269_v4 = vpop.permute.xlu0 %268 }
 0x22b   :  { %v279_v7 = vsel %vm68_vm0, %v523_v6, %v269_v4 }
 0x22c   :  { %284 = vst.msk [vmem:[#allocation7 + $0x8] sm:$0xff] %vm282_vm3, %v279_v7 }
 0x22d   :  { %299 = dma.vmem_to_hbm [thread:$0]  %s292_s16, 512, %s294_s19, [#allocation4], %s465_s29, %s465_s29, %s466_s30  }
 0x22e   :  { %460 = dma.done.wait [#allocation4], 512  }
 0x22f   :  { %461 = vsyncadd [#allocation4], 4294966784 }
 0x230   :  { %462 = dma.done.wait [#allocation9], 64  }
 0x231   :  { %463 = vsyncadd [#allocation9], 4294967232 }
 0x232   :  { %319 = vsyncpa [#allocation3], 1 }
 0x233   :  { %320 = vsyncpa [#allocation6], 1 }
 0x234   :  { %321 = vsyncpa [#allocation4], 1 }
 0x235   :  { %322 = vsyncpa [#allocation9], 1 }

</bundles_post_ra>
